<compile_context>
chip_gen: v6e
topology: v6e:2x2x1
jax: 0.10.0
libtpu: 0.0.40
codegen_flags: <defaults>
</compile_context>

<pallas_src>
import functools
import math

import jax
import jax.numpy as jnp
from jax.experimental import pallas as pl
from jax.experimental.pallas import tpu as pltpu

BN_EPS = 1e-5
LANE = 128            # lane width (last-dim padding for MXU / lane-dense stores)
SUBLANE_BF16 = 16     # bf16 sublane multiple (row padding for node dimension)


def _round_up(n, m):
    return ((n + m - 1) // m) * m


def _pad2(a, rows, cols):
    return jnp.pad(a, ((0, rows - a.shape[0]), (0, cols - a.shape[1])))


def _vmem_spec():
    return pl.BlockSpec(memory_space=pltpu.MemorySpace.VMEM)


def _vmem_limit_bytes():
    """Generation-aware scoped-VMEM budget (~3/4 of physical, capped)."""
    try:
        cap = int(getattr(pltpu.get_tpu_info(), "vmem_capacity_bytes", 64 << 20))
    except Exception:
        cap = 64 << 20
    return min(cap * 3 // 4, 100 << 20)


# ------------------------------- kernel ------------------------------------ #

def _fused_gcn_kernel(cout_ps, out_c, *refs):
    """refs = (adj, x, vecs, w_0..w_{L-1}, out).

    vecs packs per-layer (scale, shift) rows: for hidden layers BatchNorm +
    bias folded to one FMA; for the last layer scale=1, shift=bias.
    """
    num_layers = len(cout_ps)
    adj_ref, x_ref, vecs_ref = refs[0], refs[1], refs[2]
    w_refs = refs[3:3 + num_layers]
    o_ref = refs[-1]

    adj = adj_ref[...]                      # bf16 [Np, Np], VMEM-resident once
    vecs = vecs_ref[...]                    # f32  [2L, Cmax_p]
    h = x_ref[...]                          # bf16 activations [Np, Cin_p]

    for i in range(num_layers):             # static unrolled layer loop
        cp = cout_ps[i]
        w = w_refs[i][...]                  # bf16 [Cin_p, Cout_p]
        # GCNConv: two MXU matmuls, bf16 operands, f32 accumulation.
        xw = jnp.dot(h, w, preferred_element_type=jnp.float32)
        # NOTE: xw is downcast to bf16 before the adj matmul (bf16 MXU rate);
        # acceptable for inference, validated against the f32 reference.
        z = jnp.dot(adj, xw.astype(adj.dtype), preferred_element_type=jnp.float32)
        scale = vecs[2 * i:2 * i + 1, :cp]
        shift = vecs[2 * i + 1:2 * i + 2, :cp]
        z = z * scale + shift               # bias + BatchNorm folded to one FMA
        if i < num_layers - 1:
            # ReLU; dropout is identity in eval mode.
            h = jnp.maximum(z, 0.0).astype(adj.dtype)
        else:
            # Numerically stable log_softmax over the REAL classes only.
            cols = jax.lax.broadcasted_iota(jnp.int32, z.shape, 1)
            z = jnp.where(cols < out_c, z, -1e30)
            m = jnp.max(z, axis=-1, keepdims=True)
            s = z - m
            lse = jnp.log(jnp.sum(jnp.exp(s), axis=-1, keepdims=True))
            o_ref[...] = (s - lse).astype(o_ref.dtype)


# ------------------------------- wrapper ------------------------------------ #

def build_gcn_forward(adj, params, eps=BN_EPS):
    """Prepare (pad/cast/pack) everything once; return a jitted forward(x).

    Analogue of GCNConv(cached=True): adj and parameters are padded, cast to
    bf16 and BN-folded exactly once, so the per-call path is just the padding
    of x, one pallas_call, and the output slice.
    """
    num_layers = len(params["w"])
    n = adj.shape[0]
    in_c = params["w"][0].shape[0]
    out_c = params["w"][-1].shape[1]

    n_p = _round_up(max(n, SUBLANE_BF16), SUBLANE_BF16)
    cin_ps = [_round_up(params["w"][i].shape[0], LANE) for i in range(num_layers)]
    cout_ps = [_round_up(params["w"][i].shape[1], LANE) for i in range(num_layers)]
    out_cp = cout_ps[-1]
    c_max_p = max(cout_ps)

    # --- one-time padded / cast / folded inputs ---------------------------- #
    adj_p = _pad2(adj, n_p, n_p).astype(jnp.bfloat16)
    weights = [
        _pad2(params["w"][i], cin_ps[i], cout_ps[i]).astype(jnp.bfloat16)
        for i in range(num_layers)
    ]
    rows = []
    for i in range(num_layers):
        b = params["b"][i]
        if i < num_layers - 1:
            scale = params["gamma"][i] * jax.lax.rsqrt(params["var"][i] + eps)
            shift = (b - params["mean"][i]) * scale + params["beta"][i]
        else:
            scale = jnp.ones_like(b)
            shift = b
        rows.append(_pad2(scale, 1, c_max_p))
        rows.append(_pad2(shift, 1, c_max_p))
    vecs = jnp.concatenate(rows, axis=0).astype(jnp.float32)   # [2L, Cmax_p]

    # --- VMEM budget (single-buffered whole-array residency) --------------- #
    vmem_limit = _vmem_limit_bytes()
    input_bytes = (adj_p.size * 2 + n_p * cin_ps[0] * 2 + vecs.size * 4
                   + sum(int(w.size) * 2 for w in weights))
    act_bytes = 3 * n_p * c_max_p * 4          # live f32 xw / z / h per layer
    out_bytes = n_p * out_cp * 4
    est_bytes = input_bytes + act_bytes + out_bytes
    assert est_bytes + (2 << 20) < vmem_limit, (
        "fused GCN exceeds the VMEM budget on this TPU generation; use the "
        "row-tiled/streamed variant (see TODO at top of file)")

    flops = sum(2 * n_p * cin_ps[i] * cout_ps[i] + 2 * n_p * n_p * cout_ps[i]
                for i in range(num_layers))
    cost = pl.CostEstimate(flops=flops,
                           transcendentals=n_p * out_cp + n_p,
                           bytes_accessed=input_bytes + out_bytes)

    kernel = functools.partial(_fused_gcn_kernel, tuple(cout_ps), out_c)
    n_inputs = 3 + num_layers

    @jax.jit
    def _forward(x, adj_pp, vecs_p, *ws):
        x_p = _pad2(x, n_p, cin_ps[0]).astype(jnp.bfloat16)
        out_p = pl.pallas_call(
            kernel,
            out_shape=jax.ShapeDtypeStruct((n_p, out_cp), jnp.float32),
            in_specs=[_vmem_spec()] * n_inputs,
            out_specs=_vmem_spec(),
            compiler_params=pltpu.CompilerParams(vmem_limit_bytes=vmem_limit),
            cost_estimate=cost,
        )(adj_pp, x_p, vecs_p, *ws)
        return out_p[:n, :out_c]

    return lambda x: _forward(x, adj_p, vecs, *weights)


# ------------------------- pure-JAX reference ------------------------------ #

def gcn_forward_ref(x, adj, params):
    num_layers = len(params["w"])
    for i in range(num_layers - 1):
        h = adj @ (x @ params["w"][i]) + params["b"][i]
        inv = jax.lax.rsqrt(params["var"][i] + BN_EPS)
        h = (h - params["mean"][i]) * inv * params["gamma"][i] + params["beta"][i]
        x = jnp.maximum(h, 0.0)
    h = adj @ (x @ params["w"][-1]) + params["b"][-1]
    return jax.nn.log_softmax(h, axis=-1)


# ----------------------------- setup helpers ------------------------------- #

def make_params(key, in_channels, hidden_channels, out_channels, num_layers):
    dims = [in_channels] + [hidden_channels] * (num_layers - 1) + [out_channels]
    ws, bs, gammas, betas, means, varis = [], [], [], [], [], []
    for i in range(num_layers):
        key, kw, kb = jax.random.split(key, 3)
        fan_in, fan_out = dims[i], dims[i + 1]
        scale = jnp.sqrt(6.0 / (fan_in + fan_out))          # glorot-uniform, like GCNConv
        ws.append(jax.random.uniform(kw, (fan_in, fan_out), jnp.float32, -scale, scale))
        bs.append(jax.random.uniform(kb, (1, fan_out), jnp.float32, -0.1, 0.1))
        if i < num_layers - 1:
            key, kg, kbt, km, kv = jax.random.split(key, 5)
            gammas.append(jax.random.uniform(kg, (1, fan_out), jnp.float32, 0.5, 1.5))
            betas.append(jax.random.uniform(kbt, (1, fan_out), jnp.float32, -0.5, 0.5))
            means.append(jax.random.uniform(km, (1, fan_out), jnp.float32, -0.5, 0.5))
            varis.append(jax.random.uniform(kv, (1, fan_out), jnp.float32, 0.5, 1.5))
    return {"w": ws, "b": bs, "gamma": gammas, "beta": betas,
            "mean": means, "var": varis}


def make_norm_adj(key, n):
    a = (jax.random.uniform(key, (n, n)) < 0.1).astype(jnp.float32)
    a = jnp.maximum(a, a.T)                         # symmetrize
    a = a + jnp.eye(n, dtype=jnp.float32)           # add self loops
    deg = jnp.sum(a, axis=1)
    dinv = jax.lax.rsqrt(deg)
    return a * dinv[:, None] * dinv[None, :]        # D^-1/2 (A+I) D^-1/2


# --------------------------------- main ------------------------------------ #

if __name__ == "__main__":
    N = 64                 # nodes
    IN_C, HID_C, OUT_C = 16, 32, 8
    NUM_LAYERS = 3
    DROPOUT = 0.5          # identity in eval mode

    key = jax.random.PRNGKey(0)
    kx, kadj, kp = jax.random.split(key, 3)

    x = jax.random.normal(kx, (N, IN_C), jnp.float32)
    adj = make_norm_adj(kadj, N)
    params = make_params(kp, IN_C, HID_C, OUT_C, NUM_LAYERS)

    # One-time preparation (cached adjacency / weights), then per-call forward.
    gcn_forward = build_gcn_forward(adj, params)

    out = jax.block_until_ready(gcn_forward(x))
    ref = gcn_forward_ref(x, adj, params)

    assert out.shape == (N, OUT_C)
    # bf16 MXU operands (f32 accumulation) -> relaxed tolerance vs f32 reference.
    assert jnp.allclose(out, ref, atol=1e-1, rtol=1e-2), "mismatch vs reference"

    print("KERNEL_OK")
</pallas_src>

<mosaic_0001>
module attributes {stable_mosaic.version = 11 : i64} {
  func.func @_fused_gcn_kernel(%arg0: memref<64x64xbf16, #tpu.memory_space<vmem>>, %arg1: memref<64x128xbf16, #tpu.memory_space<vmem>>, %arg2: memref<6x128xf32, #tpu.memory_space<vmem>>, %arg3: memref<128x128xbf16, #tpu.memory_space<vmem>>, %arg4: memref<128x128xbf16, #tpu.memory_space<vmem>>, %arg5: memref<128x128xbf16, #tpu.memory_space<vmem>>, %arg6: memref<64x128xf32, #tpu.memory_space<vmem>>) attributes {dimension_semantics = [], scalar_prefetch = 0 : i64, scratch_operands = 0 : i64, tpu.core_type = #tpu.core_type<tc>} {
    %c0 = arith.constant 0 : index
    %c0_0 = arith.constant 0 : index
    %0 = vector.load %arg0[%c0, %c0_0] : memref<64x64xbf16, #tpu.memory_space<vmem>>, vector<64x64xbf16>
    %c0_1 = arith.constant 0 : index
    %c0_2 = arith.constant 0 : index
    %1 = vector.load %arg2[%c0_1, %c0_2] : memref<6x128xf32, #tpu.memory_space<vmem>>, vector<6x128xf32>
    %c0_3 = arith.constant 0 : index
    %c0_4 = arith.constant 0 : index
    %2 = vector.load %arg1[%c0_3, %c0_4] : memref<64x128xbf16, #tpu.memory_space<vmem>>, vector<64x128xbf16>
    %c0_5 = arith.constant 0 : index
    %c0_6 = arith.constant 0 : index
    %3 = vector.load %arg3[%c0_5, %c0_6] : memref<128x128xbf16, #tpu.memory_space<vmem>>, vector<128x128xbf16>
    %cst = arith.constant dense<0.000000e+00> : vector<64x128xf32>
    %4 = tpu.matmul %2, %3, %cst {dimension_numbers = #tpu.dot_dimension_numbers<[1], [0], [0], [1], [0, 0, 1, 1], [], []>} : vector<64x128xbf16>, vector<128x128xbf16>, vector<64x128xf32> -> vector<64x128xf32>
    %5 = arith.truncf %4 : vector<64x128xf32> to vector<64x128xbf16>
    %cst_7 = arith.constant dense<0.000000e+00> : vector<64x128xf32>
    %6 = tpu.matmul %0, %5, %cst_7 {dimension_numbers = #tpu.dot_dimension_numbers<[1], [0], [0], [1], [0, 0, 1, 1], [], []>} : vector<64x64xbf16>, vector<64x128xbf16>, vector<64x128xf32> -> vector<64x128xf32>
    %7 = vector.extract_strided_slice %1 {offsets = [0, 0], sizes = [1, 128], strides = [1, 1]} : vector<6x128xf32> to vector<1x128xf32>
    %8 = vector.extract_strided_slice %1 {offsets = [1, 0], sizes = [1, 128], strides = [1, 1]} : vector<6x128xf32> to vector<1x128xf32>
    %9 = vector.broadcast %7 : vector<1x128xf32> to vector<64x128xf32>
    %10 = arith.mulf %6, %9 : vector<64x128xf32>
    %11 = vector.broadcast %8 : vector<1x128xf32> to vector<64x128xf32>
    %12 = arith.addf %10, %11 : vector<64x128xf32>
    %cst_8 = arith.constant 0.000000e+00 : f32
    %13 = vector.broadcast %cst_8 : f32 to vector<64x128xf32>
    %14 = arith.maximumf %12, %13 : vector<64x128xf32>
    %15 = arith.truncf %14 : vector<64x128xf32> to vector<64x128xbf16>
    %c0_9 = arith.constant 0 : index
    %c0_10 = arith.constant 0 : index
    %16 = vector.load %arg4[%c0_9, %c0_10] : memref<128x128xbf16, #tpu.memory_space<vmem>>, vector<128x128xbf16>
    %cst_11 = arith.constant dense<0.000000e+00> : vector<64x128xf32>
    %17 = tpu.matmul %15, %16, %cst_11 {dimension_numbers = #tpu.dot_dimension_numbers<[1], [0], [0], [1], [0, 0, 1, 1], [], []>} : vector<64x128xbf16>, vector<128x128xbf16>, vector<64x128xf32> -> vector<64x128xf32>
    %18 = arith.truncf %17 : vector<64x128xf32> to vector<64x128xbf16>
    %cst_12 = arith.constant dense<0.000000e+00> : vector<64x128xf32>
    %19 = tpu.matmul %0, %18, %cst_12 {dimension_numbers = #tpu.dot_dimension_numbers<[1], [0], [0], [1], [0, 0, 1, 1], [], []>} : vector<64x64xbf16>, vector<64x128xbf16>, vector<64x128xf32> -> vector<64x128xf32>
    %20 = vector.extract_strided_slice %1 {offsets = [2, 0], sizes = [1, 128], strides = [1, 1]} : vector<6x128xf32> to vector<1x128xf32>
    %21 = vector.extract_strided_slice %1 {offsets = [3, 0], sizes = [1, 128], strides = [1, 1]} : vector<6x128xf32> to vector<1x128xf32>
    %22 = vector.broadcast %20 : vector<1x128xf32> to vector<64x128xf32>
    %23 = arith.mulf %19, %22 : vector<64x128xf32>
    %24 = vector.broadcast %21 : vector<1x128xf32> to vector<64x128xf32>
    %25 = arith.addf %23, %24 : vector<64x128xf32>
    %cst_13 = arith.constant 0.000000e+00 : f32
    %26 = vector.broadcast %cst_13 : f32 to vector<64x128xf32>
    %27 = arith.maximumf %25, %26 : vector<64x128xf32>
    %28 = arith.truncf %27 : vector<64x128xf32> to vector<64x128xbf16>
    %c0_14 = arith.constant 0 : index
    %c0_15 = arith.constant 0 : index
    %29 = vector.load %arg5[%c0_14, %c0_15] : memref<128x128xbf16, #tpu.memory_space<vmem>>, vector<128x128xbf16>
    %cst_16 = arith.constant dense<0.000000e+00> : vector<64x128xf32>
    %30 = tpu.matmul %28, %29, %cst_16 {dimension_numbers = #tpu.dot_dimension_numbers<[1], [0], [0], [1], [0, 0, 1, 1], [], []>} : vector<64x128xbf16>, vector<128x128xbf16>, vector<64x128xf32> -> vector<64x128xf32>
    %31 = arith.truncf %30 : vector<64x128xf32> to vector<64x128xbf16>
    %cst_17 = arith.constant dense<0.000000e+00> : vector<64x128xf32>
    %32 = tpu.matmul %0, %31, %cst_17 {dimension_numbers = #tpu.dot_dimension_numbers<[1], [0], [0], [1], [0, 0, 1, 1], [], []>} : vector<64x64xbf16>, vector<64x128xbf16>, vector<64x128xf32> -> vector<64x128xf32>
    %33 = vector.extract_strided_slice %1 {offsets = [4, 0], sizes = [1, 128], strides = [1, 1]} : vector<6x128xf32> to vector<1x128xf32>
    %34 = vector.extract_strided_slice %1 {offsets = [5, 0], sizes = [1, 128], strides = [1, 1]} : vector<6x128xf32> to vector<1x128xf32>
    %35 = vector.broadcast %33 : vector<1x128xf32> to vector<64x128xf32>
    %36 = arith.mulf %32, %35 : vector<64x128xf32>
    %37 = vector.broadcast %34 : vector<1x128xf32> to vector<64x128xf32>
    %38 = arith.addf %36, %37 : vector<64x128xf32>
    %39 = tpu.iota {dimensions = array<i32: 1>} : vector<64x128xi32>
    %c8_i32 = arith.constant 8 : i32
    %40 = vector.broadcast %c8_i32 : i32 to vector<64x128xi32>
    %41 = arith.cmpi slt, %39, %40 : vector<64x128xi32>
    %cst_18 = arith.constant -1.000000e+30 : f32
    %42 = vector.broadcast %cst_18 : f32 to vector<64x128xf32>
    %43 = arith.select %41, %38, %42 : vector<64x128xi1>, vector<64x128xf32>
    %cst_19 = arith.constant dense<0xFF800000> : vector<64xf32>
    %44 = vector.multi_reduction <maximumf>, %43, %cst_19 [1] : vector<64x128xf32> to vector<64xf32>
    %45 = vector.shape_cast %44 : vector<64xf32> to vector<64x1xf32>
    %46 = vector.broadcast %45 : vector<64x1xf32> to vector<64x128xf32>
    %47 = arith.subf %43, %46 : vector<64x128xf32>
    %48 = math.exp %47 : vector<64x128xf32>
    %cst_20 = arith.constant dense<0.000000e+00> : vector<64xf32>
    %49 = vector.multi_reduction <add>, %48, %cst_20 [1] : vector<64x128xf32> to vector<64xf32>
    %50 = vector.shape_cast %49 : vector<64xf32> to vector<64x1xf32>
    %51 = math.log %50 : vector<64x1xf32>
    %52 = vector.broadcast %51 : vector<64x1xf32> to vector<64x128xf32>
    %53 = arith.subf %47, %52 : vector<64x128xf32>
    %c0_21 = arith.constant 0 : index
    %c0_22 = arith.constant 0 : index
    %54 = vector.load %arg6[%c0_21, %c0_22] : memref<64x128xf32, #tpu.memory_space<vmem>>, vector<64x128xf32>
    tpu.vector_store %arg6[%c0_21, %c0_22], %53 {strides = array<i32>} : memref<64x128xf32, #tpu.memory_space<vmem>>, vector<64x128xf32>,
    return
  }
}

</mosaic_0001>

<bundles_post_ra>
// kernel: _forward.1
= control target key start
LH: loop header
LB: loop body
LE: loop exit
PB: predicated region body
PF: predicated region fallthrough
CT: control target
= control target key end

     0   :  { %11 = vsyncpa [#allocation3], 0  ;;  %s1512_s0 = inlined_call_operand.hbm [shape: bf16[64,64], index: 0, kind: input, shape index: {}]   ;;  %s1513_s1 = inlined_call_operand.vmem [shape: bf16[64,128], index: 1, kind: input, shape index: {}]   ;;  %s1514_s2 = inlined_call_operand.hbm [shape: f32[6,128], index: 2, kind: input, shape index: {}]   ;;  %s1515_s3 = inlined_call_operand.vmem [shape: bf16[128,128], index: 3, kind: input, shape index: {}]   ;;  %s1516_s4 = inlined_call_operand.vmem [shape: bf16[128,128], index: 4, kind: input, shape index: {}]   ;;  %s1517_s5 = inlined_call_operand.hbm [shape: bf16[128,128], index: 5, kind: input, shape index: {}]   ;;  %s1518_s6 = inlined_call_operand.vmem [shape: f32[64,128], index: 6, kind: output, shape index: {}]  }
   0x1   :  { %12 = vsyncpa [#allocation5], 0  ;;  %s1289_s21 = smov [#allocation4]   ;;  %s1290_s23 = smov [#allocation2]  }
   0x2   :  { %s33_s22 = sshll.u32 %s1289_s21, 4  ;;  %s18_s24 = sshll.u32 %s1290_s23, 4  ;;  %s34_s22 = int_to_ptr.vmem [resolvable:$true] %s33_s22  ;;  %s19_s24 = int_to_ptr.vmem [resolvable:$true] %s18_s24 }
   0x3   :  { %s1233_s25 = scalar_lea.vmem %s34_s22, 128  ;;  %p1238_p1 = scmp.lt.s32.totalorder %s34_s22, %s34_s22 }
   0x4   :  { %p1234_p0 = scmp.ne.s32.totalorder %s34_s22, %s1233_s25  ;;  %p1239_p2 = scmp.lt.s32.totalorder %s1233_s25, %s1233_s25 }
   0x6   :  { %p1240_p3 = por %p1239_p2, %p1238_p1 }
   0x8   :  { %p1241_p4 = pnand %p1240_p3, %p1234_p0 }
   0xa   :  { %1244 = shalt.err (!%p1241_p4)
}
   0xb   :  { %36 = dma.hbm_to_vmem [thread:$0]  %s1514_s2, 128, %s34_s22, [#allocation5]  }
   0xc   :  { %s1253_s28 = scalar_lea.vmem %s19_s24, 512  ;;  %p1258_p6 = scmp.lt.s32.totalorder %s19_s24, %s19_s24 }
   0xd   :  { %p1254_p5 = scmp.ne.s32.totalorder %s19_s24, %s1253_s28  ;;  %p1259_p7 = scmp.lt.s32.totalorder %s1253_s28, %s1253_s28 }
   0xf   :  { %p1260_p8 = por %p1259_p7, %p1258_p6 }
  0x11   :  { %p1261_p9 = pnand %p1260_p8, %p1254_p5 }
  0x13   :  { %1264 = shalt.err (!%p1261_p9)
}
  0x14   :  { %s1291_s29 = smov 64   ;;  %s1292_s30 = smov 4  }
  0x15   :  { %24 = dma.hbm_to_vmem [thread:$0]  %s1512_s0, 512, %s19_s24, [#allocation3], %s1291_s29, %s1291_s29, %s1292_s30  }
  0x16   :  { %s1293_s9 = smov [#allocation6]  }
  0x17   :  { %s46_s10 = sshll.u32 %s1293_s9, 4  ;;  %s47_s10 = int_to_ptr.vmem [resolvable:$true] %s46_s10 }
  0x18   :  { %s1273_s11 = scalar_lea.vmem %s47_s10, 1024  ;;  %p1278_p11 = scmp.lt.s32.totalorder %s47_s10, %s47_s10 }
  0x19   :  { %p1274_p10 = scmp.ne.s32.totalorder %s47_s10, %s1273_s11  ;;  %p1279_p12 = scmp.lt.s32.totalorder %s1273_s11, %s1273_s11 }
  0x1b   :  { %p1280_p13 = por %p1279_p12, %p1278_p11 }
  0x1d   :  { %p1281_p0 = pnand %p1280_p13, %p1274_p10 }
  0x1f   :  { %1284 = shalt.err (!%p1281_p0)
}
  0x20   :  { %52 = dma.hbm_to_vmem [thread:$0]  %s1517_s5, 1024, %s47_s10, [#allocation5], %s1291_s29, %s1291_s29, %s1292_s30  }
  0x21   :  { %1285 = dma.done.wait [#allocation3], 512  }
  0x22   :  { %1286 = vsyncadd [#allocation3], 4294966784 }
  0x23   :  { %1287 = dma.done.wait [#allocation5], 1152  }
  0x24   :  { %1288 = vsyncadd [#allocation5], 4294966144  ;;  %v1161_v0 = vld [vmem:[%s1515_s3 + $0x38] sm:$0xff]   ;;  %v1162_v1 = vld [vmem:[%s1515_s3 + $0x30] sm:$0xff]   ;;  %vm257_vm0 = vcmask 523264   ;;  %v335_v36 = vlaneseq }
  0x25   :  { %1036 = vmatprep.subr.bf16.mxu0 %v1161_v0  ;;  %v1163_v2 = vld [vmem:[%s1515_s3 + $0x28] sm:$0xff]   ;;  %v1164_v3 = vld [vmem:[%s1515_s3 + $0x20] sm:$0xff]   ;;  %v1165_v5 = vld [vmem:[%s1515_s3 + $0x18] sm:$0xff]  }
  0x26   :  { %1037 = vmatpush3.bf16.msra.mxu0 %v1161_v0  ;;  %v1169_v4 = vld [vmem:[%s1513_s1] sm:$0xff]   ;;  %v1166_v6 = vld [vmem:[%s1515_s3 + $0x10] sm:$0xff]   ;;  %v1167_v7 = vld [vmem:[%s1515_s3 + $0x8] sm:$0xff]   ;;  %v1417_v37 = vshrl.u32 %v335_v36, 7 }
  0x27   :  { %1038 = vmatprep.subr.bf16.mxu0 %v1162_v1  ;;  %1052 = vmatprep.mubr.bf16.mxu0 %v1169_v4  ;;  %v1168_v8 = vld [vmem:[%s1515_s3] sm:$0xff]   ;;  %v1170_v9 = vld [vmem:[%s1513_s1 + $0x8] sm:$0xff]   ;;  %v1171_v10 = vld [vmem:[%s1513_s1 + $0x10] sm:$0xff]  }
  0x28   :  { %v1172_v11 = vld [vmem:[%s1513_s1 + $0x18] sm:$0xff]   ;;  %v1374_v12 = vld [vmem:[#allocation2] sm:$0xff]   ;;  %v1383_v26 = vld [vmem:[#allocation2 + $0x8] sm:$0xff]   ;;  %v337_v38 = vsub.s32 0, %v1417_v37  ;;  %v349_v42 = vsub.s32 1, %v1417_v37 }
  0x29   :  { %1068 = vmatprep.mubr.msk.bf16.mxu1 %vm257_vm0, %v1374_v12  ;;  %v1177_v25 = vld [vmem:[%s1516_s4 + $0x38] sm:$0xff]   ;;  %v1385_v27 = vld [vmem:[#allocation2 + $0x10] sm:$0xff]   ;;  %v1179_v29 = vld [vmem:[%s1516_s4 + $0x28] sm:$0xff]  }
  0x2a   :  { %1039 = vmatpush3.bf16.msra.mxu0 %v1162_v1  ;;  %v1178_v28 = vld [vmem:[%s1516_s4 + $0x30] sm:$0xff]   ;;  %v1397_v30 = vld [vmem:[#allocation2 + $0x18] sm:$0xff]   ;;  %v1180_v31 = vld [vmem:[%s1516_s4 + $0x20] sm:$0xff]  }
  0x2b   :  { %1040 = vmatprep.subr.bf16.mxu0 %v1163_v2  ;;  %v1181_v32 = vld [vmem:[%s1516_s4 + $0x18] sm:$0xff]   ;;  %v1182_v33 = vld [vmem:[%s1516_s4 + $0x10] sm:$0xff]   ;;  %v1183_v34 = vld [vmem:[%s1516_s4 + $0x8] sm:$0xff]  }
  0x2c   :  { %v1184_v35 = vld [vmem:[%s1516_s4] sm:$0xff]  }
  0x2d   :  { %v1420_v39 = vld [vmem:[#allocation4] sm:$0x3f] }
  0x2e   :  { %1041 = vmatpush3.bf16.msra.mxu0 %v1163_v2  ;;  %v338_v41 = vrot.slane %v1420_v39, %v337_v38  ;;  %v350_v46 = vrot.slane %v1420_v39, %v349_v42  ;;  %v1191_v38 = vld [vmem:[#allocation6 + $0x8] sm:$0xff]  }
  0x2f   :  { %1042 = vmatprep.subr.bf16.mxu0 %v1164_v3 }
  0x32   :  { %1043 = vmatpush3.bf16.msra.mxu0 %v1164_v3 }
  0x33   :  { %1044 = vmatprep.subr.bf16.mxu0 %v1165_v5 }
  0x36   :  { %1045 = vmatpush3.bf16.msra.mxu0 %v1165_v5 }
  0x37   :  { %1046 = vmatprep.subr.bf16.mxu0 %v1166_v6 }
  0x3a   :  { %1047 = vmatpush3.bf16.msra.mxu0 %v1166_v6 }
  0x3b   :  { %1048 = vmatprep.subr.bf16.mxu0 %v1167_v7 }
  0x3e   :  { %1049 = vmatpush3.bf16.msra.mxu0 %v1167_v7 }
  0x3f   :  { %1050 = vmatprep.subr.bf16.mxu0 %v1168_v8 }
  0x42   :  { %1051 = vmatpush3.bf16.msra.mxu0 %v1168_v8 }
  0x45   :  { %1053 = vmatmul.mubr.bf16.vlgmr.msra.gmra.mxu0 %v1170_v9 }
  0x46   :  { %1056 = vmatprep.mubr.bf16.mxu0 %v1171_v10 }
  0x4d   :  { %1057 = vmatmul.mubr.bf16.gmra.mxu0 %v1172_v11 }
  0x4e   :  { %1108 = vmatprep.mubr.msk.bf16.mxu0 %vm257_vm0, %v1374_v12 }
 0x105   :  { %v1054_v13 = vpop.f32.mrf.mxu0 }
 0x107   :  { %v202_v14 = vpop.f32.mrf.mxu0 }
 0x109   :  { %v1055_v15 = vpop.f32.mrf.mxu0 }
 0x10a   :  { %v234_v23 = vpack.c.bf16 %v1055_v15, %v1054_v13 }
 0x10b   :  { %v205_v16 = vpop.f32.mrf.mxu0 }
 0x10c   :  { %v233_v24 = vpack.c.bf16 %v205_v16, %v202_v14 }
 0x10d   :  { %v1058_v17 = vpop.f32.mrf.mxu0 }
 0x10f   :  { %v218_v18 = vpop.f32.mrf.mxu0 }
 0x111   :  { %v1059_v19 = vpop.f32.mrf.mxu0 }
 0x112   :  { %v236_v20 = vpack.c.bf16 %v1059_v19, %v1058_v17 }
 0x113   :  { %v221_v21 = vpop.f32.mrf.mxu0 }
 0x114   :  { %v235_v22 = vpack.c.bf16 %v221_v21, %v218_v18  ;;  %1060 = vmatprep.subr.bf16.mxu1 %v236_v20 }
 0x115   :  { %1061 = vmatpush3.bf16.msra.mxu1 %v236_v20 }
 0x116   :  { %1062 = vmatprep.subr.bf16.mxu1 %v235_v22 }
 0x119   :  { %1063 = vmatpush3.bf16.msra.mxu1 %v235_v22 }
 0x11a   :  { %1064 = vmatprep.subr.bf16.mxu1 %v234_v23 }
 0x11d   :  { %1065 = vmatpush3.bf16.msra.mxu1 %v234_v23 }
 0x11e   :  { %1066 = vmatprep.subr.bf16.mxu1 %v233_v24 }
 0x121   :  { %1067 = vmatpush3.bf16.msra.mxu1 %v233_v24 }
 0x122   :  { %1076 = vmatprep.subr.bf16.mxu1 %v1177_v25 }
 0x124   :  { %1069 = vmatmul.mubr.msk.bf16.vlgmr.msra.gmra.mxu1 %vm257_vm0, %v1383_v26 }
 0x125   :  { %1072 = vmatprep.mubr.msk.bf16.mxu1 %vm257_vm0, %v1385_v27  ;;  %1077 = vmatpush3.bf16.msra.mxu1 %v1177_v25 }
 0x126   :  { %1078 = vmatprep.subr.bf16.mxu1 %v1178_v28 }
 0x129   :  { %1079 = vmatpush3.bf16.msra.mxu1 %v1178_v28 }
 0x12a   :  { %1080 = vmatprep.subr.bf16.mxu1 %v1179_v29 }
 0x12c   :  { %1073 = vmatmul.mubr.msk.bf16.gmra.mxu1 %vm257_vm0, %v1397_v30 }
 0x12d   :  { %1081 = vmatpush3.bf16.msra.mxu1 %v1179_v29 }
 0x12e   :  { %1082 = vmatprep.subr.bf16.mxu1 %v1180_v31 }
 0x131   :  { %1083 = vmatpush3.bf16.msra.mxu1 %v1180_v31  ;;  %v1186_v31 = vld [vmem:[#allocation6 + $0x30] sm:$0xff]  }
 0x132   :  { %1084 = vmatprep.subr.bf16.mxu1 %v1181_v32 }
 0x135   :  { %1085 = vmatpush3.bf16.msra.mxu1 %v1181_v32  ;;  %v1187_v32 = vld [vmem:[#allocation6 + $0x28] sm:$0xff]  }
 0x136   :  { %1086 = vmatprep.subr.bf16.mxu1 %v1182_v33 }
 0x139   :  { %1087 = vmatpush3.bf16.msra.mxu1 %v1182_v33  ;;  %v1188_v33 = vld [vmem:[#allocation6 + $0x20] sm:$0xff]  }
 0x13a   :  { %1088 = vmatprep.subr.bf16.mxu1 %v1183_v34 }
 0x13d   :  { %1089 = vmatpush3.bf16.msra.mxu1 %v1183_v34  ;;  %v1189_v34 = vld [vmem:[#allocation6 + $0x18] sm:$0xff]  }
 0x13e   :  { %1090 = vmatprep.subr.bf16.mxu1 %v1184_v35 }
 0x141   :  { %1091 = vmatpush3.bf16.msra.mxu1 %v1184_v35  ;;  %v1190_v35 = vld [vmem:[#allocation6 + $0x10] sm:$0xff]  }
 0x1e4   :  { %v1070_v40 = vpop.f32.mrf.mxu1 }
 0x1e5   :  { %v341_v45 = vmul.f32 %v1070_v40, %v338_v41  ;;  %v1192_v40 = vld [vmem:[#allocation6] sm:$0xff]  }
 0x1e6   :  { %v304_v43 = vpop.f32.mrf.mxu1 }
 0x1e7   :  { %v339_v44 = vmul.f32 %v338_v41, %v304_v43  ;;  %v353_v53 = vadd.f32 %v350_v46, %v341_v45 }
 0x1e8   :  { %v1071_v47 = vpop.f32.mrf.mxu1 }
 0x1e9   :  { %v342_v48 = vmul.f32 %v1071_v47, %v338_v41  ;;  %v351_v50 = vadd.f32 %v350_v46, %v339_v44  ;;  %v361_v61 = vmax.f32 %v353_v53, 0.0  ;;  %v583_v44 = vsub.s32 3, %v1417_v37 }
 0x1ea   :  { %v307_v49 = vpop.f32.mrf.mxu1 }
 0x1eb   :  { %v354_v51 = vadd.f32 %v350_v46, %v342_v48  ;;  %v340_v52 = vmul.f32 %v338_v41, %v307_v49  ;;  %v359_v58 = vmax.f32 %v351_v50, 0.0  ;;  %v584_v48 = vrot.slane %v1420_v39, %v583_v44 }
 0x1ec   :  { %v1074_v54 = vpop.f32.mrf.mxu1 }
 0x1ed   :  { %v352_v55 = vadd.f32 %v350_v46, %v340_v52  ;;  %v362_v56 = vmax.f32 %v354_v51, 0.0  ;;  %v345_v62 = vmul.f32 %v1074_v54, %v338_v41 }
 0x1ee   :  { %v320_v57 = vpop.f32.mrf.mxu1 }
 0x1ef   :  { %v360_v59 = vmax.f32 %v352_v55, 0.0  ;;  %v343_v60 = vmul.f32 %v338_v41, %v320_v57  ;;  %v368_v2 = vpack.c.bf16 %v362_v56, %v361_v61  ;;  %v357_v7 = vadd.f32 %v350_v46, %v345_v62 }
 0x1f0   :  { %v1075_v63 = vpop.f32.mrf.mxu1 }
 0x1f1   :  { %v346_v0 = vmul.f32 %v1075_v63, %v338_v41  ;;  %v367_v1 = vpack.c.bf16 %v360_v59, %v359_v58  ;;  %v355_v4 = vadd.f32 %v350_v46, %v343_v60  ;;  %v365_v13 = vmax.f32 %v357_v7, 0.0 }
 0x1f2   :  { %v323_v3 = vpop.f32.mrf.mxu1 }
 0x1f3   :  { %v358_v5 = vadd.f32 %v350_v46, %v346_v0  ;;  %v344_v6 = vmul.f32 %v338_v41, %v323_v3  ;;  %1092 = vmatprep.mubr.bf16.mxu1 %v367_v1  ;;  %v363_v10 = vmax.f32 %v355_v4, 0.0  ;;  %v571_v41 = vsub.s32 2, %v1417_v37 }
 0x1f4   :  { %1093 = vmatmul.mubr.bf16.vlgmr.msra.gmra.mxu1 %v368_v2 }
 0x1f5   :  { %v356_v8 = vadd.f32 %v350_v46, %v344_v6  ;;  %v366_v9 = vmax.f32 %v358_v5, 0.0  ;;  %v572_v43 = vrot.slane %v1420_v39, %v571_v41 }
 0x1f7   :  { %v364_v11 = vmax.f32 %v356_v8, 0.0  ;;  %v370_v15 = vpack.c.bf16 %v366_v9, %v365_v13 }
 0x1f9   :  { %v369_v14 = vpack.c.bf16 %v364_v11, %v363_v10 }
 0x1fb   :  { %1096 = vmatprep.mubr.bf16.mxu1 %v369_v14 }
 0x1fc   :  { %1097 = vmatmul.mubr.bf16.gmra.mxu1 %v370_v15 }
 0x1fd   :  { %1148 = vmatprep.mubr.msk.bf16.mxu1 %vm257_vm0, %v1374_v12  ;;  %v1185_v12 = vld [vmem:[#allocation6 + $0x38] sm:$0xff]  }
 0x2b4   :  { %v1094_v16 = vpop.f32.mrf.mxu1 }
 0x2b6   :  { %v469_v17 = vpop.f32.mrf.mxu1 }
 0x2b8   :  { %v1095_v18 = vpop.f32.mrf.mxu1 }
 0x2b9   :  { %v501_v28 = vpack.c.bf16 %v1095_v18, %v1094_v16 }
 0x2ba   :  { %v472_v19 = vpop.f32.mrf.mxu1 }
 0x2bb   :  { %v500_v29 = vpack.c.bf16 %v472_v19, %v469_v17 }
 0x2bc   :  { %v1098_v20 = vpop.f32.mrf.mxu1 }
 0x2be   :  { %v485_v21 = vpop.f32.mrf.mxu1 }
 0x2c0   :  { %v1099_v22 = vpop.f32.mrf.mxu1 }
 0x2c1   :  { %v503_v23 = vpack.c.bf16 %v1099_v22, %v1098_v20 }
 0x2c2   :  { %v488_v24 = vpop.f32.mrf.mxu1 }
 0x2c3   :  { %v502_v25 = vpack.c.bf16 %v488_v24, %v485_v21  ;;  %1100 = vmatprep.subr.bf16.mxu0 %v503_v23 }
 0x2c4   :  { %1101 = vmatpush3.bf16.msra.mxu0 %v503_v23 }
 0x2c5   :  { %1102 = vmatprep.subr.bf16.mxu0 %v502_v25 }
 0x2c8   :  { %1103 = vmatpush3.bf16.msra.mxu0 %v502_v25 }
 0x2c9   :  { %1104 = vmatprep.subr.bf16.mxu0 %v501_v28 }
 0x2cc   :  { %1105 = vmatpush3.bf16.msra.mxu0 %v501_v28 }
 0x2cd   :  { %1106 = vmatprep.subr.bf16.mxu0 %v500_v29 }
 0x2d0   :  { %1107 = vmatpush3.bf16.msra.mxu0 %v500_v29 }
 0x2d1   :  { %1116 = vmatprep.subr.bf16.mxu0 %v1185_v12 }
 0x2d3   :  { %1109 = vmatmul.mubr.msk.bf16.vlgmr.msra.gmra.mxu0 %vm257_vm0, %v1383_v26 }
 0x2d4   :  { %1112 = vmatprep.mubr.msk.bf16.mxu0 %vm257_vm0, %v1385_v27  ;;  %1117 = vmatpush3.bf16.msra.mxu0 %v1185_v12 }
 0x2d5   :  { %1118 = vmatprep.subr.bf16.mxu0 %v1186_v31 }
 0x2d8   :  { %1119 = vmatpush3.bf16.msra.mxu0 %v1186_v31 }
 0x2d9   :  { %1120 = vmatprep.subr.bf16.mxu0 %v1187_v32 }
 0x2db   :  { %1113 = vmatmul.mubr.msk.bf16.gmra.mxu0 %vm257_vm0, %v1397_v30 }
 0x2dc   :  { %1121 = vmatpush3.bf16.msra.mxu0 %v1187_v32  ;;  %v805_v32 = vsub.s32 4, %v1417_v37 }
 0x2dd   :  { %1122 = vmatprep.subr.bf16.mxu0 %v1188_v33 }
 0x2e0   :  { %1123 = vmatpush3.bf16.msra.mxu0 %v1188_v33  ;;  %v817_v33 = vsub.s32 5, %v1417_v37 }
 0x2e1   :  { %1124 = vmatprep.subr.bf16.mxu0 %v1189_v34 }
 0x2e4   :  { %1125 = vmatpush3.bf16.msra.mxu0 %v1189_v34  ;;  %v806_v34 = vrot.slane %v1420_v39, %v805_v32 }
 0x2e5   :  { %1126 = vmatprep.subr.bf16.mxu0 %v1190_v35 }
 0x2e8   :  { %1127 = vmatpush3.bf16.msra.mxu0 %v1190_v35  ;;  %v828_v35 = vand.u32 127, %v335_v36 }
 0x2e9   :  { %1128 = vmatprep.subr.bf16.mxu0 %v1191_v38 }
 0x2ea   :  { %vm829_vm1 = vcmp.lt.s32.totalorder %v828_v35, 8 }
 0x2ec   :  { %1129 = vmatpush3.bf16.msra.mxu0 %v1191_v38  ;;  %v818_v38 = vrot.slane %v1420_v39, %v817_v33 }
 0x2ed   :  { %1130 = vmatprep.subr.bf16.mxu0 %v1192_v40 }
 0x2f0   :  { %1131 = vmatpush3.bf16.msra.mxu0 %v1192_v40 }
 0x393   :  { %v1110_v42 = vpop.f32.mrf.mxu0 }
 0x394   :  { %v575_v47 = vmul.f32 %v1110_v42, %v572_v43 }
 0x395   :  { %v538_v45 = vpop.f32.mrf.mxu0 }
 0x396   :  { %v573_v46 = vmul.f32 %v572_v43, %v538_v45  ;;  %v587_v55 = vadd.f32 %v584_v48, %v575_v47 }
 0x397   :  { %v1111_v49 = vpop.f32.mrf.mxu0 }
 0x398   :  { %v576_v50 = vmul.f32 %v1111_v49, %v572_v43  ;;  %v585_v52 = vadd.f32 %v584_v48, %v573_v46  ;;  %v595_v63 = vmax.f32 %v587_v55, 0.0 }
 0x399   :  { %v541_v51 = vpop.f32.mrf.mxu0 }
 0x39a   :  { %v588_v53 = vadd.f32 %v584_v48, %v576_v50  ;;  %v574_v54 = vmul.f32 %v572_v43, %v541_v51  ;;  %v593_v60 = vmax.f32 %v585_v52, 0.0 }
 0x39b   :  { %v1114_v56 = vpop.f32.mrf.mxu0 }
 0x39c   :  { %v586_v57 = vadd.f32 %v584_v48, %v574_v54  ;;  %v596_v58 = vmax.f32 %v588_v53, 0.0  ;;  %v579_v0 = vmul.f32 %v1114_v56, %v572_v43 }
 0x39d   :  { %v554_v59 = vpop.f32.mrf.mxu0 }
 0x39e   :  { %v594_v61 = vmax.f32 %v586_v57, 0.0  ;;  %v577_v62 = vmul.f32 %v572_v43, %v554_v59  ;;  %v602_v4 = vpack.c.bf16 %v596_v58, %v595_v63  ;;  %v591_v9 = vadd.f32 %v584_v48, %v579_v0 }
 0x39f   :  { %v1115_v1 = vpop.f32.mrf.mxu0 }
 0x3a0   :  { %v580_v2 = vmul.f32 %v1115_v1, %v572_v43  ;;  %v601_v3 = vpack.c.bf16 %v594_v61, %v593_v60  ;;  %v589_v6 = vadd.f32 %v584_v48, %v577_v62  ;;  %v599_v15 = vmax.f32 %v591_v9, 0.0 }
 0x3a1   :  { %v557_v5 = vpop.f32.mrf.mxu0 }
 0x3a2   :  { %v592_v7 = vadd.f32 %v584_v48, %v580_v2  ;;  %v578_v8 = vmul.f32 %v572_v43, %v557_v5  ;;  %1132 = vmatprep.mubr.bf16.mxu0 %v601_v3  ;;  %v597_v13 = vmax.f32 %v589_v6, 0.0 }
 0x3a3   :  { %1133 = vmatmul.mubr.bf16.vlgmr.msra.gmra.mxu0 %v602_v4 }
 0x3a4   :  { %v590_v10 = vadd.f32 %v584_v48, %v578_v8  ;;  %v600_v11 = vmax.f32 %v592_v7, 0.0 }
 0x3a6   :  { %v598_v14 = vmax.f32 %v590_v10, 0.0  ;;  %v604_v17 = vpack.c.bf16 %v600_v11, %v599_v15 }
 0x3a8   :  { %v603_v16 = vpack.c.bf16 %v598_v14, %v597_v13 }
 0x3aa   :  { %1136 = vmatprep.mubr.bf16.mxu0 %v603_v16 }
 0x3ab   :  { %1137 = vmatmul.mubr.bf16.gmra.mxu0 %v604_v17 }
 0x463   :  { %v1134_v18 = vpop.f32.mrf.mxu0 }
 0x465   :  { %v703_v19 = vpop.f32.mrf.mxu0 }
 0x467   :  { %v1135_v20 = vpop.f32.mrf.mxu0 }
 0x468   :  { %v735_v12 = vpack.c.bf16 %v1135_v20, %v1134_v18 }
 0x469   :  { %v706_v21 = vpop.f32.mrf.mxu0 }
 0x46a   :  { %v734_v31 = vpack.c.bf16 %v706_v21, %v703_v19 }
 0x46b   :  { %v1138_v22 = vpop.f32.mrf.mxu0 }
 0x46d   :  { %v719_v23 = vpop.f32.mrf.mxu0 }
 0x46f   :  { %v1139_v24 = vpop.f32.mrf.mxu0 }
 0x470   :  { %v737_v25 = vpack.c.bf16 %v1139_v24, %v1138_v22 }
 0x471   :  { %v722_v28 = vpop.f32.mrf.mxu0 }
 0x472   :  { %v736_v29 = vpack.c.bf16 %v722_v28, %v719_v23  ;;  %1140 = vmatprep.subr.bf16.mxu1 %v737_v25 }
 0x473   :  { %1141 = vmatpush3.bf16.msra.mxu1 %v737_v25 }
 0x474   :  { %1142 = vmatprep.subr.bf16.mxu1 %v736_v29 }
 0x477   :  { %1143 = vmatpush3.bf16.msra.mxu1 %v736_v29 }
 0x478   :  { %1144 = vmatprep.subr.bf16.mxu1 %v735_v12 }
 0x47b   :  { %1145 = vmatpush3.bf16.msra.mxu1 %v735_v12 }
 0x47c   :  { %1146 = vmatprep.subr.bf16.mxu1 %v734_v31 }
 0x47f   :  { %1147 = vmatpush3.bf16.msra.mxu1 %v734_v31 }
 0x482   :  { %1149 = vmatmul.mubr.msk.bf16.vlgmr.msra.gmra.mxu1 %vm257_vm0, %v1383_v26 }
 0x483   :  { %1152 = vmatprep.mubr.msk.bf16.mxu1 %vm257_vm0, %v1385_v27 }
 0x48a   :  { %1153 = vmatmul.mubr.msk.bf16.gmra.mxu1 %vm257_vm0, %v1397_v30 }
 0x542   :  { %v1150_v40 = vpop.f32.mrf.mxu1 }
 0x543   :  { %v809_v41 = vmul.f32 %v1150_v40, %v806_v34 }
 0x544   :  { %v772_v42 = vpop.f32.mrf.mxu1 }
 0x545   :  { %v807_v26 = vmul.f32 %v806_v34, %v772_v42  ;;  %v821_v43 = vadd.f32 %v818_v38, %v809_v41 }
 0x546   :  { %v1151_v27 = vpop.f32.mrf.mxu1 }
 0x547   :  { %v810_v44 = vmul.f32 %v1151_v27, %v806_v34  ;;  %v832_v30 = vsel %vm829_vm1, %v821_v43, -1e+30  ;;  %v819_v45 = vadd.f32 %v818_v38, %v807_v26 }
 0x548   :  { %842 = vmax.xlane.f32.xlu1 %v832_v30  ;;  %v775_v46 = vpop.f32.mrf.mxu1 }
 0x549   :  { %v808_v37 = vmul.f32 %v806_v34, %v775_v46  ;;  %v830_v47 = vsel %vm829_vm1, %v819_v45, -1e+30  ;;  %v822_v48 = vadd.f32 %v818_v38, %v810_v44 }
 0x54a   :  { %838 = vmax.xlane.f32.xlu0 %v830_v47  ;;  %v1154_v36 = vpop.f32.mrf.mxu1 }
 0x54b   :  { %v833_v39 = vsel %vm829_vm1, %v822_v48, -1e+30  ;;  %v820_v49 = vadd.f32 %v818_v38, %v808_v37  ;;  %v813_v51 = vmul.f32 %v1154_v36, %v806_v34 }
 0x54c   :  { %844 = vmax.xlane.f32.xlu1 %v833_v39  ;;  %v788_v50 = vpop.f32.mrf.mxu1 }
 0x54d   :  { %v811_v52 = vmul.f32 %v806_v34, %v788_v50  ;;  %v831_v53 = vsel %vm829_vm1, %v820_v49, -1e+30  ;;  %v825_v60 = vadd.f32 %v818_v38, %v813_v51 }
 0x54e   :  { %840 = vmax.xlane.f32.xlu0 %v831_v53  ;;  %v1155_v54 = vpop.f32.mrf.mxu1 }
 0x54f   :  { %v823_v55 = vadd.f32 %v818_v38, %v811_v52  ;;  %v814_v57 = vmul.f32 %v1155_v54, %v806_v34  ;;  %v836_v62 = vsel %vm829_vm1, %v825_v60, -1e+30 }
 0x550   :  { %v791_v56 = vpop.f32.mrf.mxu1 }
 0x551   :  { %v812_v58 = vmul.f32 %v806_v34, %v791_v56  ;;  %v834_v59 = vsel %vm829_vm1, %v823_v55, -1e+30  ;;  %v826_v0 = vadd.f32 %v818_v38, %v814_v57 }
 0x552   :  { %846 = vmax.xlane.f32.xlu0 %v834_v59 }
 0x553   :  { %v824_v61 = vadd.f32 %v818_v38, %v812_v58  ;;  %v837_v1 = vsel %vm829_vm1, %v826_v0, -1e+30 }
 0x555   :  { %v835_v63 = vsel %vm829_vm1, %v824_v61, -1e+30 }
 0x556   :  { %850 = vmax.xlane.f32.xlu0 %v836_v62  ;;  %848 = vmax.xlane.f32.xlu1 %v835_v63 }
 0x55a   :  { %852 = vmax.xlane.f32.xlu1 %v837_v1 }
 0x5d1   :  { %v843_v2 = vpop.xlane.xlu1 %842 }
 0x5d2   :  { %v1456_v3 = vsub.f32 %v832_v30, %v843_v2 }
 0x5d3   :  { %v839_v4 = vpop.xlane.xlu0 %838 }
 0x5d4   :  { %v866_v5 = vmul.f32 1.442695, %v1456_v3  ;;  %v1459_v6 = vsub.f32 %v830_v47, %v839_v4 }
 0x5d5   :  { %v845_v7 = vpop.xlane.xlu1 %844 }
 0x5d6   :  { %1193 = vpow2.f32 %v866_v5  ;;  %v862_v8 = vmul.f32 1.442695, %v1459_v6  ;;  %v1462_v9 = vsub.f32 %v833_v39, %v845_v7 }
 0x5d7   :  { %v841_v10 = vpop.xlane.xlu0 %840 }
 0x5d8   :  { %v868_v11 = vmul.f32 1.442695, %v1462_v9  ;;  %v1465_v13 = vsub.f32 %v831_v53, %v841_v10  ;;  %1195 = vpow2.f32 %v862_v8 }
 0x5da   :  { %1197 = vpow2.f32 %v868_v11  ;;  %v864_v14 = vmul.f32 1.442695, %v1465_v13 }
 0x5db   :  { %v847_v15 = vpop.xlane.xlu0 %846 }
 0x5dc   :  { %v1468_v16 = vsub.f32 %v834_v59, %v847_v15  ;;  %1199 = vpow2.f32 %v864_v14 }
 0x5de   :  { %v870_v17 = vmul.f32 1.442695, %v1468_v16 }
 0x5df   :  { %v851_v18 = vpop.xlane.xlu0 %850  ;;  %v849_v19 = vpop.xlane.xlu1 %848 }
 0x5e0   :  { %1201 = vpow2.f32 %v870_v17  ;;  %v1471_v20 = vsub.f32 %v836_v62, %v851_v18  ;;  %v1473_v21 = vsub.f32 %v835_v63, %v849_v19 }
 0x5e2   :  { %v874_v22 = vmul.f32 1.442695, %v1471_v20  ;;  %v872_v23 = vmul.f32 1.442695, %v1473_v21 }
 0x5e3   :  { %v1194_v24 = vpop.eup %1193  ;;  %v853_v25 = vpop.xlane.xlu1 %852 }
 0x5e4   :  { %1203 = vpow2.f32 %v874_v22  ;;  %v1477_v28 = vsub.f32 %v837_v1, %v853_v25  ;;  %882 = vadd.xlane.f32.xlu0 %v1194_v24 }
 0x5e5   :  { %1205 = vpow2.f32 %v872_v23  ;;  %v1196_v29 = vpop.eup %1195 }
 0x5e6   :  { %v876_v12 = vmul.f32 1.442695, %v1477_v28 }
 0x5e7   :  { %v1198_v31 = vpop.eup %1197 }
 0x5e8   :  { %1207 = vpow2.f32 %v876_v12  ;;  %878 = vadd.xlane.f32.xlu0 %v1196_v29  ;;  %884 = vadd.xlane.f32.xlu1 %v1198_v31 }
 0x5e9   :  { %v1200_v32 = vpop.eup %1199 }
 0x5ec   :  { %880 = vadd.xlane.f32.xlu1 %v1200_v32 }
 0x5ed   :  { %v1202_v33 = vpop.eup %1201 }
 0x5ee   :  { %886 = vadd.xlane.f32.xlu0 %v1202_v33 }
 0x5f1   :  { %v1204_v34 = vpop.eup %1203 }
 0x5f2   :  { %v1206_v35 = vpop.eup %1205  ;;  %890 = vadd.xlane.f32.xlu0 %v1204_v34 }
 0x5f3   :  { %888 = vadd.xlane.f32.xlu1 %v1206_v35 }
 0x5f5   :  { %v1208_v38 = vpop.eup %1207 }
 0x5f7   :  { %892 = vadd.xlane.f32.xlu1 %v1208_v38 }
 0x66d   :  { %v883_v40 = vpop.xlane.xlu0 %882 }
 0x66e   :  { %1209 = vlog2.f32 %v883_v40 }
 0x671   :  { %v879_v41 = vpop.xlane.xlu0 %878  ;;  %v885_v42 = vpop.xlane.xlu1 %884 }
 0x672   :  { %1211 = vlog2.f32 %v879_v41 }
 0x673   :  { %1213 = vlog2.f32 %v885_v42 }
 0x675   :  { %v881_v26 = vpop.xlane.xlu1 %880 }
 0x676   :  { %1215 = vlog2.f32 %v881_v26 }
 0x677   :  { %v887_v43 = vpop.xlane.xlu0 %886 }
 0x678   :  { %1217 = vlog2.f32 %v887_v43 }
 0x67b   :  { %v1210_v27 = vpop.eup %1209  ;;  %v891_v44 = vpop.xlane.xlu0 %890 }
 0x67c   :  { %v899_v30 = vmul.f32 0.6931472, %v1210_v27  ;;  %1219 = vlog2.f32 %v891_v44  ;;  %v889_v45 = vpop.xlane.xlu1 %888 }
 0x67d   :  { %1221 = vlog2.f32 %v889_v45 }
 0x67e   :  { %v912_v46 = vsub.f32 %v1456_v3, %v899_v30 }
 0x67f   :  { %v1212_v37 = vpop.eup %1211 }
 0x680   :  { %v1214_v47 = vpop.eup %1213  ;;  %920 = vst [vmem:[%s1518_s6 + $0x10] sm:$0xff] %v912_v46  ;;  %v895_v48 = vmul.f32 0.6931472, %v1212_v37  ;;  %v893_v36 = vpop.xlane.xlu1 %892 }
 0x681   :  { %v901_v39 = vmul.f32 0.6931472, %v1214_v47  ;;  %1223 = vlog2.f32 %v893_v36 }
 0x682   :  { %v910_v49 = vsub.f32 %v1459_v6, %v895_v48 }
 0x683   :  { %v1216_v50 = vpop.eup %1215  ;;  %v913_v51 = vsub.f32 %v1462_v9, %v901_v39 }
 0x684   :  { %918 = vst [vmem:[%s1518_s6] sm:$0xff] %v910_v49  ;;  %v897_v52 = vmul.f32 0.6931472, %v1216_v50 }
 0x685   :  { %v1218_v53 = vpop.eup %1217  ;;  %921 = vst [vmem:[%s1518_s6 + $0x18] sm:$0xff] %v913_v51 }
 0x686   :  { %v911_v54 = vsub.f32 %v1465_v13, %v897_v52  ;;  %v903_v55 = vmul.f32 0.6931472, %v1218_v53 }
 0x688   :  { %919 = vst [vmem:[%s1518_s6 + $0x8] sm:$0xff] %v911_v54  ;;  %v914_v56 = vsub.f32 %v1468_v16, %v903_v55 }
 0x689   :  { %v1220_v57 = vpop.eup %1219 }
 0x68a   :  { %v1222_v58 = vpop.eup %1221  ;;  %922 = vst [vmem:[%s1518_s6 + $0x20] sm:$0xff] %v914_v56  ;;  %v907_v59 = vmul.f32 0.6931472, %v1220_v57 }
 0x68b   :  { %v905_v60 = vmul.f32 0.6931472, %v1222_v58 }
 0x68c   :  { %v916_v61 = vsub.f32 %v1471_v20, %v907_v59 }
 0x68d   :  { %v915_v62 = vsub.f32 %v1473_v21, %v905_v60 }
 0x68e   :  { %v1224_v63 = vpop.eup %1223  ;;  %924 = vst [vmem:[%s1518_s6 + $0x30] sm:$0xff] %v916_v61 }
 0x68f   :  { %923 = vst [vmem:[%s1518_s6 + $0x28] sm:$0xff] %v915_v62  ;;  %v909_v0 = vmul.f32 0.6931472, %v1224_v63 }
 0x691   :  { %v917_v1 = vsub.f32 %v1477_v28, %v909_v0 }
 0x693   :  { %925 = vst [vmem:[%s1518_s6 + $0x38] sm:$0xff] %v917_v1 }
 0x694   :  { %930 = vsyncpa [#allocation3], 1 }
 0x695   :  { %931 = vsyncpa [#allocation5], 1 }

</bundles_post_ra>
